<compile_context>
chip_gen: v7x
topology: tpu7x:2x2x1
jax: 0.10.0
libtpu: 0.0.40
codegen_flags: <defaults>
</compile_context>

<pallas_src>
import functools

import jax
import jax.numpy as jnp
from jax.experimental import pallas as pl
from jax.experimental.pallas import tpu as pltpu


def _round_up(v: int, m: int) -> int:
    return ((v + m - 1) // m) * m


def _choose_tile(size: int, max_tile: int, align: int, min_blocks: int = 1):
    """Pick a tile (multiple of `align`, at most ~max_tile) minimizing padding waste.

    Returns (tile, padded_size) with padded_size = n_blocks * tile.
    """
    padded = _round_up(size, align)
    n_blocks = max(min_blocks, -(-padded // max_tile))
    tile = _round_up(-(-size // n_blocks), align)
    return tile, n_blocks * tile


def _linear_adapter_kernel(x_ref, w_hi_ref, w_lo_ref, b_ref, o_ref):
    """One (tm, tn) output tile, accumulated in place over the K grid axis."""
    k = pl.program_id(2)

    @pl.when(k == 0)
    def _():
        # Fold the bias into the accumulator init (no separate epilogue add/copy).
        o_ref[...] = jnp.broadcast_to(b_ref[...], o_ref.shape)

    x = x_ref[...]  # bf16 tile (exact image of x.float() for bf16 inputs)
    # bf16_2x weight split: bf16 x bf16 products are exact in the f32 accumulator, and
    # hi + lo represents the f32 weights to ~2^-16 relative, so two MXU passes recover
    # near-f32 Linear numerics at bf16 MXU throughput.
    o_ref[...] += (
        jnp.dot(x, w_hi_ref[...], preferred_element_type=jnp.float32)
        + jnp.dot(x, w_lo_ref[...], preferred_element_type=jnp.float32)
    )


def prepare_linear_adapter_params(weight, bias, *, tn=512, tk=1024):
    """One-time weight prep: transpose to (K, N), pad to tile multiples, bf16 hi/lo split.

    Call once at model init and cache the result — this is the only HBM pass over W;
    the per-call path (linear_adapter_apply) never touches the original weight again.
    """
    N, K = weight.shape
    _, Np = _choose_tile(N, tn, 128, min_blocks=2 if N >= 256 else 1)
    _, Kp = _choose_tile(K, tk, 128)

    w = weight.astype(jnp.float32).T  # (K, N), MXU-friendly layout
    if (Kp, Np) != (K, N):
        w = jnp.pad(w, ((0, Kp - K), (0, Np - N)))
    w_hi = w.astype(jnp.bfloat16)
    w_lo = (w - w_hi.astype(jnp.float32)).astype(jnp.bfloat16)

    b = bias.astype(jnp.float32).reshape(1, N)
    if Np != N:
        b = jnp.pad(b, ((0, 0), (0, Np - N)))
    return w_hi, w_lo, b


@functools.partial(jax.jit, static_argnames=("out_features", "tm", "tn", "tk"))
def linear_adapter_apply(x, w_hi, w_lo, bias_p, *, out_features,
                         tm=512, tn=512, tk=1024):
    """y = x.astype(f32) @ weight.T + bias, with weights pre-prepared.

    x:      (..., K)  any float dtype (fed to the MXU as bf16; exact for bf16 inputs)
    w_hi/w_lo: (Kp, Np) bf16 hi/lo split of weight.T (from prepare_linear_adapter_params)
    bias_p: (1, Np)   float32 padded bias
    returns (..., out_features) float32
    """
    orig_shape = x.shape
    K = orig_shape[-1]
    M = 1
    for d in orig_shape[:-1]:
        M *= d
    N = out_features

    x2 = x.reshape(M, K)
    if x2.dtype != jnp.bfloat16:
        x2 = x2.astype(jnp.bfloat16)

    tm_eff, Mp = _choose_tile(M, tm, 8)
    tn_eff, Np = _choose_tile(N, tn, 128, min_blocks=2 if N >= 256 else 1)
    tk_eff, Kp = _choose_tile(K, tk, 128)
    assert (Kp, Np) == w_hi.shape, "weights were prepared with different tn/tk"

    if (Mp, Kp) != (M, K):
        x2 = jnp.pad(x2, ((0, Mp - M), (0, Kp - K)))

    grid = (Mp // tm_eff, Np // tn_eff, Kp // tk_eff)  # reduction axis K last

    out = pl.pallas_call(
        _linear_adapter_kernel,
        out_shape=jax.ShapeDtypeStruct((Mp, Np), jnp.float32),
        grid_spec=pltpu.PrefetchScalarGridSpec(
            num_scalar_prefetch=0,
            grid=grid,
            in_specs=[
                pl.BlockSpec((tm_eff, tk_eff), lambda i, j, k: (i, k)),   # x tile
                pl.BlockSpec((tk_eff, tn_eff), lambda i, j, k: (k, j)),   # W^T hi tile
                pl.BlockSpec((tk_eff, tn_eff), lambda i, j, k: (k, j)),   # W^T lo tile
                pl.BlockSpec((1, tn_eff), lambda i, j, k: (0, j)),        # bias tile
            ],
            # k-invariant output block: stays VMEM-resident across the K sweep and is
            # accumulated in place (no scratch accumulator, no extra VMEM copy).
            out_specs=pl.BlockSpec((tm_eff, tn_eff), lambda i, j, k: (i, j)),
        ),
        compiler_params=pltpu.CompilerParams(
            dimension_semantics=("parallel", "parallel", "arbitrary"),
        ),
    )(x2, w_hi, w_lo, bias_p)

    out = out[:M, :N]
    return out.reshape(orig_shape[:-1] + (N,))


def linear_adapter(x, weight, bias, *, tm=512, tn=512, tk=1024):
    """Convenience one-shot wrapper. In real use, hoist the prepare() call and cache it."""
    w_hi, w_lo, b_p = prepare_linear_adapter_params(weight, bias, tn=tn, tk=tk)
    return linear_adapter_apply(x, w_hi, w_lo, b_p, out_features=weight.shape[0],
                                tm=tm, tn=tn, tk=tk)


if __name__ == "__main__":
    # Shapes implied by the module: x: (batch, in_dim) -> (batch, out_dim).
    batch, in_dim, out_dim = 8, 32, 16

    key = jax.random.PRNGKey(0)
    kx, kw, kb = jax.random.split(key, 3)

    # nn.Linear-style uniform(-1/sqrt(K), 1/sqrt(K)) init.
    bound = 1.0 / (in_dim ** 0.5)
    weight = jax.random.uniform(kw, (out_dim, in_dim), jnp.float32, -bound, bound)
    bias = jax.random.uniform(kb, (out_dim,), jnp.float32, -bound, bound)

    # bf16 input exercises the explicit .type(torch.float32) cast path losslessly.
    x = jax.random.normal(kx, (batch, in_dim), jnp.bfloat16)

    # Hoisted weight prep (done once), then the lightweight per-call apply.
    w_hi, w_lo, b_p = prepare_linear_adapter_params(weight, bias)
    y = linear_adapter_apply(x, w_hi, w_lo, b_p, out_features=out_dim)
    y = jax.block_until_ready(y)

    # Pure-JAX reference of the module's forward, forced to true f32 matmul precision.
    y_ref = jnp.dot(x.astype(jnp.float32), weight.T,
                    precision=jax.lax.Precision.HIGHEST) + bias

    assert y.shape == (batch, out_dim) and y.dtype == jnp.float32
    assert jnp.allclose(y, y_ref, atol=5e-5, rtol=5e-5), \
        float(jnp.max(jnp.abs(y - y_ref)))

    print("KERNEL_OK")
</pallas_src>

<mosaic_0001>
module attributes {stable_mosaic.version = 11 : i64} {
  func.func @_linear_adapter_kernel(%arg0: i32, %arg1: i32, %arg2: i32, %arg3: memref<8x128xbf16, #tpu.memory_space<vmem>>, %arg4: memref<128x128xbf16, #tpu.memory_space<vmem>>, %arg5: memref<128x128xbf16, #tpu.memory_space<vmem>>, %arg6: memref<1x128xf32, #tpu.memory_space<vmem>>, %arg7: memref<8x128xf32, #tpu.memory_space<vmem>>) attributes {dimension_semantics = [#tpu.dimension_semantics<parallel>, #tpu.dimension_semantics<parallel>, #tpu.dimension_semantics<arbitrary>], iteration_bounds = array<i64: 1, 1, 1>, scalar_prefetch = 0 : i64, scratch_operands = 0 : i64, tpu.core_type = #tpu.core_type<tc>, window_params = [{transform_indices = @transform_0, window_bounds = array<i64: 8, 128>}, {transform_indices = @transform_1, window_bounds = array<i64: 128, 128>}, {transform_indices = @transform_2, window_bounds = array<i64: 128, 128>}, {transform_indices = @transform_3, window_bounds = array<i64: 1, 128>}, {transform_indices = @transform_4, window_bounds = array<i64: 8, 128>}]} {
    %c0_i32 = arith.constant 0 : i32
    %0 = arith.cmpi eq, %arg2, %c0_i32 : i32
    %1 = arith.extui %0 : i1 to i32
    %c0_i32_0 = arith.constant 0 : i32
    %2 = arith.cmpi ne, %1, %c0_i32_0 : i32
    scf.if %2 {
      %c0_11 = arith.constant 0 : index
      %c0_12 = arith.constant 0 : index
      %12 = vector.load %arg6[%c0_11, %c0_12] : memref<1x128xf32, #tpu.memory_space<vmem>>, vector<1x128xf32>
      %13 = vector.shape_cast %12 : vector<1x128xf32> to vector<1x128xf32>
      %14 = vector.broadcast %13 : vector<1x128xf32> to vector<8x128xf32>
      %c0_13 = arith.constant 0 : index
      %c0_14 = arith.constant 0 : index
      %15 = vector.load %arg7[%c0_13, %c0_14] : memref<8x128xf32, #tpu.memory_space<vmem>>, vector<8x128xf32>
      tpu.vector_store %arg7[%c0_13, %c0_14], %14 {strides = array<i32>} : memref<8x128xf32, #tpu.memory_space<vmem>>, vector<8x128xf32>,
    } else {
    }
    %c0 = arith.constant 0 : index
    %c0_1 = arith.constant 0 : index
    %3 = vector.load %arg3[%c0, %c0_1] : memref<8x128xbf16, #tpu.memory_space<vmem>>, vector<8x128xbf16>
    %c0_2 = arith.constant 0 : index
    %c0_3 = arith.constant 0 : index
    %4 = vector.load %arg7[%c0_2, %c0_3] : memref<8x128xf32, #tpu.memory_space<vmem>>, vector<8x128xf32>
    %c0_4 = arith.constant 0 : index
    %c0_5 = arith.constant 0 : index
    %5 = vector.load %arg4[%c0_4, %c0_5] : memref<128x128xbf16, #tpu.memory_space<vmem>>, vector<128x128xbf16>
    %cst = arith.constant dense<0.000000e+00> : vector<8x128xf32>
    %6 = tpu.matmul %3, %5, %cst {dimension_numbers = #tpu.dot_dimension_numbers<[1], [0], [0], [1], [0, 0, 1, 1], [], []>} : vector<8x128xbf16>, vector<128x128xbf16>, vector<8x128xf32> -> vector<8x128xf32>
    %c0_6 = arith.constant 0 : index
    %c0_7 = arith.constant 0 : index
    %7 = vector.load %arg5[%c0_6, %c0_7] : memref<128x128xbf16, #tpu.memory_space<vmem>>, vector<128x128xbf16>
    %cst_8 = arith.constant dense<0.000000e+00> : vector<8x128xf32>
    %8 = tpu.matmul %3, %7, %cst_8 {dimension_numbers = #tpu.dot_dimension_numbers<[1], [0], [0], [1], [0, 0, 1, 1], [], []>} : vector<8x128xbf16>, vector<128x128xbf16>, vector<8x128xf32> -> vector<8x128xf32>
    %9 = arith.addf %6, %8 : vector<8x128xf32>
    %10 = arith.addf %4, %9 : vector<8x128xf32>
    %c0_9 = arith.constant 0 : index
    %c0_10 = arith.constant 0 : index
    %11 = vector.load %arg7[%c0_9, %c0_10] : memref<8x128xf32, #tpu.memory_space<vmem>>, vector<8x128xf32>
    tpu.vector_store %arg7[%c0_9, %c0_10], %10 {strides = array<i32>} : memref<8x128xf32, #tpu.memory_space<vmem>>, vector<8x128xf32>,
    return
  }
  func.func @transform_0(%arg0: i32, %arg1: i32, %arg2: i32) -> (i32, i32) {
    %c0_i32 = arith.constant 0 : i32
    return %arg0, %arg2 : i32, i32
  }
  func.func @transform_1(%arg0: i32, %arg1: i32, %arg2: i32) -> (i32, i32) {
    %c0_i32 = arith.constant 0 : i32
    return %arg2, %arg1 : i32, i32
  }
  func.func @transform_2(%arg0: i32, %arg1: i32, %arg2: i32) -> (i32, i32) {
    %c0_i32 = arith.constant 0 : i32
    return %arg2, %arg1 : i32, i32
  }
  func.func @transform_3(%arg0: i32, %arg1: i32, %arg2: i32) -> (i32, i32) {
    %c0_i32 = arith.constant 0 : i32
    %c0_i32_0 = arith.constant 0 : i32
    return %c0_i32, %arg1 : i32, i32
  }
  func.func @transform_4(%arg0: i32, %arg1: i32, %arg2: i32) -> (i32, i32) {
    %c0_i32 = arith.constant 0 : i32
    return %arg0, %arg1 : i32, i32
  }
}

</mosaic_0001>

<bundles_post_ra>
// kernel: linear_adapter_apply.1
= control target key start
LH: loop header
LB: loop body
LE: loop exit
PB: predicated region body
PF: predicated region fallthrough
CT: control target
= control target key end

     0   :  { %9 = vsyncpa [#allocation3], 0  ;;  %s531_s0 = inlined_call_operand.vmem [shape: bf16[8,128], index: 0, kind: input, shape index: {}]   ;;  %s532_s1 = inlined_call_operand.hbm [shape: bf16[128,128], index: 1, kind: input, shape index: {}]   ;;  %s533_s2 = inlined_call_operand.hbm [shape: bf16[128,128], index: 2, kind: input, shape index: {}]   ;;  %s534_s3 = inlined_call_operand.vmem [shape: f32[1,128], index: 3, kind: input, shape index: {}]   ;;  %s535_s4 = inlined_call_operand.hbm [shape: f32[8,128], index: 4, kind: output, shape index: {}]  }
   0x1   :  { %10 = vsyncpa [#allocation6], 0 }
   0x2   :  { %11 = vsyncpa [#allocation4], 0  ;;  %s457_s15 = smov [#allocation2]   ;;  %s385_s19 = scalar_lea.hbm %s532_s1, 1024 }
   0x3   :  { %s19_s16 = sshll.u32 %s457_s15, 4  ;;  %p386_p0 = scmp.ne.s32.totalorder %s532_s1, %s385_s19  ;;  %s20_s16 = int_to_ptr.vmem [resolvable:$true] %s19_s16 }
   0x4   :  { %p389_p1 = scmp.lt.u32.totalorder %s385_s19, %s532_s1 }
   0x6   :  { %p391_p2 = pnand %p389_p1, %p386_p0 }
   0x8   :  { %394 = shalt.err (!%p391_p2)
}
   0x9   :  { %s395_s24 = scalar_lea.vmem %s20_s16, 1024  ;;  %p400_p4 = scmp.lt.s32.totalorder %s20_s16, %s20_s16 }
   0xa   :  { %p396_p3 = scmp.ne.s32.totalorder %s20_s16, %s395_s24  ;;  %p401_p5 = scmp.lt.s32.totalorder %s395_s24, %s395_s24 }
   0xc   :  { %p402_p6 = por %p401_p5, %p400_p4 }
   0xe   :  { %p403_p7 = pnand %p402_p6, %p396_p3 }
  0x10   :  { %406 = shalt.err (!%p403_p7)
}
  0x11   :  { %s458_s25 = smov 64   ;;  %s459_s26 = smov 4  }
  0x12   :  { %25 = dma.hbm_to_vmem [thread:$0]  %s532_s1, 1024, %s20_s16, [#allocation3], %s458_s25, %s458_s25, %s459_s26  }
  0x13   :  { %s460_s29 = smov [#allocation5]   ;;  %s407_s7 = scalar_lea.hbm %s533_s2, 1024 }
  0x14   :  { %s31_s30 = sshll.u32 %s460_s29, 4  ;;  %p408_p8 = scmp.ne.s32.totalorder %s533_s2, %s407_s7  ;;  %s32_s30 = int_to_ptr.vmem [resolvable:$true] %s31_s30 }
  0x15   :  { %p411_p9 = scmp.lt.u32.totalorder %s407_s7, %s533_s2 }
  0x17   :  { %p413_p10 = pnand %p411_p9, %p408_p8 }
  0x19   :  { %416 = shalt.err (!%p413_p10)
}
  0x1a   :  { %s417_s12 = scalar_lea.vmem %s32_s30, 1024  ;;  %p422_p12 = scmp.lt.s32.totalorder %s32_s30, %s32_s30 }
  0x1b   :  { %p418_p11 = scmp.ne.s32.totalorder %s32_s30, %s417_s12  ;;  %p423_p13 = scmp.lt.s32.totalorder %s417_s12, %s417_s12 }
  0x1d   :  { %p424_p0 = por %p423_p13, %p422_p12 }
  0x1f   :  { %p425_p1 = pnand %p424_p0, %p418_p11 }
  0x21   :  { %428 = shalt.err (!%p425_p1)
}
  0x22   :  { %37 = dma.hbm_to_vmem [thread:$0]  %s533_s2, 1024, %s32_s30, [#allocation6], %s458_s25, %s458_s25, %s459_s26  }
  0x23   :  { %451 = dma.done.wait [#allocation3], 1024  }
  0x24   :  { %452 = vsyncadd [#allocation3], 4294966272 }
  0x25   :  { %453 = dma.done.wait [#allocation6], 1024  }
  0x26   :  { %454 = vsyncadd [#allocation6], 4294966272  ;;  %v461_v0 = vmov 0.0   ;;  %vm462_vm0 = vmmov 0   ;;  %v369_v1 = vld [vmem:[#allocation5] sm:$0xff]   ;;  %v371_v3 = vld [vmem:[#allocation5 + $0x8] sm:$0xff]  }
  0x27   :  { %322 = vmatprep.subr.bf16.mxu0 %v461_v0  ;;  %342 = vmatprep.subr.bf16.mxu1 %v461_v0  ;;  %v370_v2 = vld [vmem:[#allocation2] sm:$0xff]   ;;  %v372_v4 = vld [vmem:[#allocation2 + $0x8] sm:$0xff]   ;;  %v373_v5 = vld [vmem:[#allocation5 + $0x10] sm:$0xff]   ;;  %s463_s17 = smov [#allocation7]  }
  0x28   :  { %338 = vmatprep.mubr.msk.bf16.mxu0 %vm462_vm0, %v461_v0  ;;  %358 = vmatprep.mubr.msk.bf16.mxu1 %vm462_vm0, %v461_v0  ;;  %v374_v6 = vld [vmem:[#allocation2 + $0x10] sm:$0xff]   ;;  %v375_v7 = vld [vmem:[#allocation5 + $0x18] sm:$0xff]   ;;  %v377_v9 = vld [vmem:[#allocation5 + $0x20] sm:$0xff]   ;;  %s277_s18 = sshll.u32 %s463_s17, 4  ;;  %s278_s18 = int_to_ptr.vmem [resolvable:$true] %s277_s18 }
  0x29   :  { %323 = vmatpush3.bf16.msra.mxu0 %v369_v1  ;;  %343 = vmatpush3.bf16.msra.mxu1 %v370_v2  ;;  %v376_v8 = vld [vmem:[#allocation2 + $0x18] sm:$0xff]   ;;  %v378_v10 = vld [vmem:[#allocation2 + $0x20] sm:$0xff]   ;;  %v379_v11 = vld [vmem:[#allocation5 + $0x28] sm:$0xff]   ;;  %p434_p3 = scmp.lt.s32.totalorder %s278_s18, %s278_s18 }
  0x2a   :  { %324 = vmatprep.subr.bf16.mxu0 %v461_v0  ;;  %344 = vmatprep.subr.bf16.mxu1 %v461_v0  ;;  %v380_v12 = vld [vmem:[#allocation2 + $0x28] sm:$0xff]   ;;  %v381_v13 = vld [vmem:[#allocation5 + $0x30] sm:$0xff]   ;;  %v383_v15 = vld [vmem:[#allocation5 + $0x38] sm:$0xff]  }
  0x2b   :  { %v382_v14 = vld [vmem:[#allocation2 + $0x30] sm:$0xff]   ;;  %v384_v16 = vld [vmem:[#allocation2 + $0x38] sm:$0xff]  }
  0x2c   :  { %v59_v17 = vld [vmem:[%s531_s0] sm:$0xf]  ;;  %s429_s0 = scalar_lea.vmem %s278_s18, 128 }
  0x2d   :  { %325 = vmatpush3.bf16.msra.mxu0 %v371_v3  ;;  %345 = vmatpush3.bf16.msra.mxu1 %v372_v4  ;;  %v287_v19 = vld [vmem:[%s534_s3] ss:$0 sm:$0xff]  ;;  %p430_p2 = scmp.ne.s32.totalorder %s278_s18, %s429_s0  ;;  %p435_p4 = scmp.lt.s32.totalorder %s429_s0, %s429_s0 }
  0x2e   :  { %326 = vmatprep.subr.bf16.mxu0 %v461_v0  ;;  %346 = vmatprep.subr.bf16.mxu1 %v461_v0 }
  0x2f   :  { %p436_p5 = por %p435_p4, %p434_p3 }
  0x31   :  { %327 = vmatpush3.bf16.msra.mxu0 %v373_v5  ;;  %347 = vmatpush3.bf16.msra.mxu1 %v374_v6  ;;  %p437_p6 = pnand %p436_p5, %p430_p2 }
  0x32   :  { %328 = vmatprep.subr.bf16.mxu0 %v461_v0  ;;  %348 = vmatprep.subr.bf16.mxu1 %v461_v0 }
  0x35   :  { %329 = vmatpush3.bf16.msra.mxu0 %v375_v7  ;;  %349 = vmatpush3.bf16.msra.mxu1 %v376_v8 }
  0x36   :  { %330 = vmatprep.subr.bf16.mxu0 %v461_v0  ;;  %350 = vmatprep.subr.bf16.mxu1 %v461_v0 }
  0x39   :  { %331 = vmatpush3.bf16.msra.mxu0 %v377_v9  ;;  %351 = vmatpush3.bf16.msra.mxu1 %v378_v10 }
  0x3a   :  { %332 = vmatprep.subr.bf16.mxu0 %v461_v0  ;;  %352 = vmatprep.subr.bf16.mxu1 %v461_v0 }
  0x3d   :  { %333 = vmatpush3.bf16.msra.mxu0 %v379_v11  ;;  %353 = vmatpush3.bf16.msra.mxu1 %v380_v12 }
  0x3e   :  { %334 = vmatprep.subr.bf16.mxu0 %v461_v0  ;;  %354 = vmatprep.subr.bf16.mxu1 %v461_v0 }
  0x41   :  { %335 = vmatpush3.bf16.msra.mxu0 %v381_v13  ;;  %355 = vmatpush3.bf16.msra.mxu1 %v382_v14 }
  0x42   :  { %336 = vmatprep.subr.bf16.mxu0 %v461_v0  ;;  %356 = vmatprep.subr.bf16.mxu1 %v461_v0 }
  0x45   :  { %337 = vmatpush3.bf16.msra.mxu0 %v383_v15  ;;  %357 = vmatpush3.bf16.msra.mxu1 %v384_v16 }
  0x48   :  { %339 = vmatmul.mubr.bf16.vlgmr.msra.gmra.mrb[0].mxu0 %v59_v17  ;;  %359 = vmatmul.mubr.bf16.vlgmr.msra.gmra.mrb[0].mxu1 %v59_v17 }
 0x11b   :  { %v175_v18 = vpop.f32.mrb[0].mxu0  ;;  %v263_v20 = vpop.f32.mrb[0].mxu1 }
 0x11c   :  { %v340_v21 = vpop.f32.mrb[1].mxu0  ;;  %v264_v22 = vadd.f32 %v263_v20, %v175_v18  ;;  %v360_v23 = vpop.f32.mrb[1].mxu1 }
 0x11d   :  { %v178_v24 = vpop.f32.mrb[2].mxu0  ;;  %v266_v25 = vpop.f32.mrb[2].mxu1 }
 0x11e   :  { %v341_v26 = vpop.f32.mrb[3].mxu0  ;;  %v269_v27 = vadd.f32 %v287_v19, %v264_v22  ;;  %v361_v28 = vpop.f32.mrb[3].mxu1 }
 0x120   :  { %270 = vst [vmem:[#allocation7] sm:$0xff] %v269_v27 }
 0x121   :  { %440 = shalt.err (!%p437_p6)
}
 0x122   :  { %s441_s20 = scalar_lea.hbm %s535_s4, 128 }
 0x123   :  { %p442_p7 = scmp.ne.s32.totalorder %s535_s4, %s441_s20  ;;  %p445_p8 = scmp.lt.u32.totalorder %s441_s20, %s535_s4 }
 0x125   :  { %p447_p9 = pnand %p445_p8, %p442_p7 }
 0x127   :  { %450 = shalt.err (!%p447_p9)
}
 0x128   :  { %280 = dma.vmem_to_hbm [thread:$0]  %s278_s18, 128, %s535_s4, [#allocation4]  }
 0x129   :  { %455 = dma.done.wait [#allocation4], 128  }
 0x12a   :  { %456 = vsyncadd [#allocation4], 4294967168 }
 0x12b   :  { %284 = vsyncpa [#allocation3], 1 }
 0x12c   :  { %285 = vsyncpa [#allocation6], 1 }
 0x12d   :  { %286 = vsyncpa [#allocation4], 1 }

</bundles_post_ra>
